<compile_context>
chip_gen: v7x
topology: tpu7x:2x2x1
jax: 0.10.0
libtpu: 0.0.40
codegen_flags: <defaults>
</compile_context>

<pallas_src>
import functools

import numpy as np
import jax
import jax.numpy as jnp
from jax import lax
from jax.experimental import pallas as pl
from jax.experimental.pallas import tpu as pltpu


MIDDLE_SHAPE = 4096
HIDDEN1 = 1024
RES_TIMES = 5
BN_EPS = 1e-5
LANE = 128
BATCH_PAD = 16                      # bf16 packs 16 rows per vreg sublane group
VMEM_LIMIT = 48 * 1024 * 1024       # <= 64 MiB v7x per-core VMEM, with headroom


# ----------------------------------------------------------------------------
# Pallas kernels
# ----------------------------------------------------------------------------
def _linear_kernel(x_ref, w_ref, b_ref, o_ref, *, relu):
    """y = x @ W + b (optional ReLU). Full K per step; grid = (N // tn,)."""
    y = jnp.dot(x_ref[...], w_ref[...], preferred_element_type=jnp.float32)
    y = y + b_ref[...]
    if relu:
        y = jnp.maximum(y, 0.0)
    o_ref[...] = y.astype(o_ref.dtype)


def linear_pallas(x, w, b, *, relu=False, out_dtype=jnp.float32, tn=2048):
    """Fused Linear(+ReLU).  x:(B,K) bf16, w:(K,N) bf16, b:(N,) f32 -> (B,N)."""
    B, K = x.shape
    Kw, N = w.shape
    assert K == Kw
    tn = min(tn, N)
    assert N % tn == 0
    grid = (N // tn,)

    bytes_accessed = int(
        K * N * w.dtype.itemsize            # weight stream (dominant)
        + B * K * x.dtype.itemsize
        + B * N * jnp.dtype(out_dtype).itemsize
        + N * 4)

    return pl.pallas_call(
        functools.partial(_linear_kernel, relu=relu),
        out_shape=jax.ShapeDtypeStruct((B, N), out_dtype),
        grid_spec=pltpu.PrefetchScalarGridSpec(
            num_scalar_prefetch=0,
            grid=grid,
            in_specs=[
                pl.BlockSpec((B, K), lambda j: (0, 0)),    # x resident
                pl.BlockSpec((K, tn), lambda j: (0, j)),   # weight column tile
                pl.BlockSpec((1, tn), lambda j: (0, j)),   # bias tile
            ],
            out_specs=pl.BlockSpec((B, tn), lambda j: (0, j)),
        ),
        compiler_params=pltpu.CompilerParams(
            dimension_semantics=("parallel",),
            vmem_limit_bytes=VMEM_LIMIT),
        cost_estimate=pl.CostEstimate(
            flops=int(2 * B * K * N), transcendentals=0,
            bytes_accessed=bytes_accessed),
    )(x, w, b.reshape(1, N))


def _res_stack_head_kernel(x_ref, w_ref, b_ref, g_ref, be_ref, wh_ref, bh_ref,
                           o_ref, buf_ref, *, eps, b_real, tn, nt, n_layers):
    """Fused [Linear -> BatchNorm1d(train stats) -> ReLU] x L + output head.

    grid = (L, N // tn), layer axis outer.  Activations are carried between
    layers in a (2, B, K) bf16 VMEM ping-pong scratch: layer l reads slot
    (l+1) % 2 and writes slot l % 2; the layer-0 input is staged into slot 1
    once at the first grid step.  On the very last grid step the resident
    head weight produces the (B, 128) logits -- the kernel's only HBM output.
    """
    l = pl.program_id(0)
    j = pl.program_id(1)
    B = x_ref.shape[0]

    @pl.when(jnp.logical_and(l == 0, j == 0))
    def _():
        buf_ref[1] = x_ref[...]                 # stage layer-0 input, slot 1

    src = (l + 1) % 2
    dst = l % 2

    # One clean full-K contraction on the MXU: y = act @ W_l[:, tile j] + b.
    y = jnp.dot(buf_ref[src], w_ref[...], preferred_element_type=jnp.float32)
    y = y + b_ref[0]                            # (B, tn) f32

    # BatchNorm1d train-mode (biased) statistics over the *real* batch rows
    # only (padded rows excluded), matching PyTorch's batch statistics.
    if b_real == B:
        mean = jnp.mean(y, axis=0, keepdims=True)
        var = jnp.mean((y - mean) ** 2, axis=0, keepdims=True)
    else:
        row = lax.broadcasted_iota(jnp.int32, y.shape, 0)
        mask = (row < b_real).astype(jnp.float32)
        inv_n = 1.0 / float(b_real)
        mean = jnp.sum(y * mask, axis=0, keepdims=True) * inv_n
        diff = (y - mean) * mask
        var = jnp.sum(diff * diff, axis=0, keepdims=True) * inv_n

    yn = (y - mean) * lax.rsqrt(var + eps)
    yn = yn * g_ref[0] + be_ref[0]
    out_bf = jnp.maximum(yn, 0.0).astype(jnp.bfloat16)

    # Feed the next layer: static lane slice per tile (unrolled), dynamic
    # index only on the tiny leading slot axis.
    for jj in range(nt):
        @pl.when(j == jj)
        def _(jj=jj):
            buf_ref[dst, :, jj * tn:(jj + 1) * tn] = out_bf

    # Output-head epilogue on the very last grid step.
    last_slot = (n_layers - 1) % 2              # static
    @pl.when(jnp.logical_and(l == n_layers - 1, j == nt - 1))
    def _():
        logits = jnp.dot(buf_ref[last_slot], wh_ref[...],
                         preferred_element_type=jnp.float32)
        o_ref[...] = logits + bh_ref[...]


def res_stack_head_pallas(x, w_stack, b_stack, g_stack, be_stack,
                          w_head, b_head, *, b_real, eps=BN_EPS, tn=2048):
    """x:(B,D) bf16; w_stack:(L,D,D) bf16; b/g/be:(L,1,D) f32;
    w_head:(D,NH) bf16; b_head:(NH,) f32  ->  logits (B, NH) f32."""
    B, K = x.shape
    L, Kw, N = w_stack.shape
    assert K == Kw and K == N
    tn = min(tn, N)
    assert N % tn == 0
    nt = N // tn
    Kh, NH = w_head.shape
    assert Kh == K

    w2d = w_stack.reshape(L * K, N)             # (L*K, N): block (K,tn) @ (l,j)

    flops = int(2 * B * K * N * L + 2 * B * K * NH)
    bytes_accessed = int(
        L * K * N * w_stack.dtype.itemsize      # res weight stream (dominant)
        + K * NH * w_head.dtype.itemsize
        + B * K * 2 + B * NH * 4
        + 3 * L * N * 4 + NH * 4)

    kernel = functools.partial(_res_stack_head_kernel, eps=eps, b_real=b_real,
                               tn=tn, nt=nt, n_layers=L)
    return pl.pallas_call(
        kernel,
        out_shape=jax.ShapeDtypeStruct((B, NH), jnp.float32),
        grid_spec=pltpu.PrefetchScalarGridSpec(
            num_scalar_prefetch=0,
            grid=(L, nt),
            in_specs=[
                pl.BlockSpec((B, K), lambda l, j: (0, 0)),         # x (resident)
                pl.BlockSpec((K, tn), lambda l, j: (l, j)),        # W_l[:, tile j]
                pl.BlockSpec((1, 1, tn), lambda l, j: (l, 0, j)),  # bias
                pl.BlockSpec((1, 1, tn), lambda l, j: (l, 0, j)),  # gamma
                pl.BlockSpec((1, 1, tn), lambda l, j: (l, 0, j)),  # beta
                pl.BlockSpec((K, NH), lambda l, j: (0, 0)),        # head W (resident)
                pl.BlockSpec((1, NH), lambda l, j: (0, 0)),        # head bias
            ],
            out_specs=pl.BlockSpec((B, NH), lambda l, j: (0, 0)),  # logits
            scratch_shapes=[pltpu.VMEM((2, B, K), jnp.bfloat16)],
        ),
        compiler_params=pltpu.CompilerParams(
            dimension_semantics=("arbitrary", "arbitrary"),
            vmem_limit_bytes=VMEM_LIMIT),
        cost_estimate=pl.CostEstimate(
            flops=flops, transcendentals=0, bytes_accessed=bytes_accessed),
    )(x, w2d, b_stack, g_stack, be_stack, w_head, b_head.reshape(1, NH))


# ----------------------------------------------------------------------------
# Parameter init (deterministic, PyTorch-default-style; weights stored bf16)
# ----------------------------------------------------------------------------
def init_params(key, num_classes=16, xy_bits=3, ab_bits=1, seqlen=8):
    input_length = 2 ** xy_bits + 2 ** ab_bits
    d_in = seqlen * input_length

    def linear_init(k, fan_in, fan_out):
        kw, kb = jax.random.split(k)
        bound = 1.0 / np.sqrt(fan_in)
        w = jax.random.uniform(kw, (fan_in, fan_out), jnp.float32, -bound, bound)
        b = jax.random.uniform(kb, (fan_out,), jnp.float32, -bound, bound)
        return w, b

    keys = jax.random.split(key, 3 + RES_TIMES)
    w1, b1 = linear_init(keys[0], d_in, HIDDEN1)
    w2, b2 = linear_init(keys[1], HIDDEN1, MIDDLE_SHAPE)
    wo, bo = linear_init(keys[2], MIDDLE_SHAPE, num_classes)

    # pad the tiny classification head to a lane-dense 128-wide slab.
    n_out_pad = ((num_classes + LANE - 1) // LANE) * LANE
    wo_p = jnp.zeros((MIDDLE_SHAPE, n_out_pad), jnp.float32).at[:, :num_classes].set(wo)
    bo_p = jnp.zeros((n_out_pad,), jnp.float32).at[:num_classes].set(bo)

    res_w, res_b = [], []
    for i in range(RES_TIMES):
        w, b = linear_init(keys[3 + i], MIDDLE_SHAPE, MIDDLE_SHAPE)
        res_w.append(w)
        res_b.append(b)

    return {
        "fc1": (w1.astype(jnp.bfloat16), b1),
        "fc2": (w2.astype(jnp.bfloat16), b2),
        "out": (wo_p.astype(jnp.bfloat16), bo_p),
        "res_w": jnp.stack(res_w).astype(jnp.bfloat16),                 # (L, D, D)
        "res_b": jnp.stack(res_b).reshape(RES_TIMES, 1, MIDDLE_SHAPE),  # (L, 1, D)
        "res_gamma": jnp.ones((RES_TIMES, 1, MIDDLE_SHAPE), jnp.float32),
        "res_beta": jnp.zeros((RES_TIMES, 1, MIDDLE_SHAPE), jnp.float32),
        "num_classes": num_classes,
    }


# ----------------------------------------------------------------------------
# Forward pass (mirrors BellResFC.forward)
# ----------------------------------------------------------------------------
def bell_res_fc_forward(params, xy_seq, ab_seq, xy, ab,
                        xy_bits=3, ab_bits=1, seqlen=8):
    B = xy_seq.shape[0]
    n_xy = 2 ** xy_bits
    n_ab = 2 ** ab_bits
    num_classes = params["num_classes"]

    # input packing (glue)
    xy_oh = jax.nn.one_hot(xy_seq, n_xy, dtype=jnp.float32).reshape(B, seqlen, n_xy)
    ab_oh = jax.nn.one_hot(ab_seq, n_ab, dtype=jnp.float32).reshape(B, seqlen, n_ab)
    x = jnp.concatenate([xy_oh, ab_oh], axis=-1).reshape(B, -1)

    # pad the batch to a packed-bf16 sublane multiple (16 rows); pad rows are
    # excluded from BN stats inside the kernel and sliced off at the end.
    B_pad = ((B + BATCH_PAD - 1) // BATCH_PAD) * BATCH_PAD
    if B_pad != B:
        x = jnp.pad(x, ((0, B_pad - B), (0, 0)))
    x = x.astype(jnp.bfloat16)

    # hot path: two small linears + one fused (res-stack + head) Pallas kernel.
    # TODO(synk): fc1/fc2 could be chained into the fused call via cross-call
    # weight prefetch; kept separate here (padding their K to 4096 would add
    # more HBM traffic than the saved launch boundaries).
    w1, b1 = params["fc1"]
    x = linear_pallas(x, w1, b1, relu=True, out_dtype=jnp.bfloat16)
    w2, b2 = params["fc2"]
    x = linear_pallas(x, w2, b2, relu=True, out_dtype=jnp.bfloat16)

    wo, bo = params["out"]
    logits_pad = res_stack_head_pallas(
        x, params["res_w"], params["res_b"],
        params["res_gamma"], params["res_beta"],
        wo, bo, b_real=B, eps=BN_EPS)
    logits16 = logits_pad[:B, :num_classes]                  # (B, num_classes)

    # gather the xy-indexed row: (B, n_xy, n_ab) -> (B, n_ab)
    x3 = logits16.reshape(B, n_xy, n_ab)
    gathered = jnp.take_along_axis(x3, xy[:, None, None], axis=1)[:, 0, :]

    # CrossEntropyLoss (mean reduction)
    lse = jax.scipy.special.logsumexp(gathered, axis=1)
    picked = jnp.take_along_axis(gathered, ab[:, None], axis=1)[:, 0]
    loss = jnp.mean(lse - picked)

    maxv = jnp.max(gathered, axis=1)
    predict = jnp.argmax(gathered, axis=1)
    # numerically-stable softmax max-probability (max-subtracted)
    maxp = 1.0 / jnp.sum(jnp.exp(gathered - maxv[:, None]), axis=1)
    sum_correct = jnp.sum(predict == ab)

    # host-side info bookkeeping (mirrors the numpy post-processing)
    xy_np = np.asarray(xy)
    correct_np = np.asarray(predict == ab)
    distribution = []
    for i in range(n_xy):
        distribution.append(
            (i, int(np.sum(correct_np[xy_np == i])), int(np.sum(xy_np == i))))
    info = {
        "distribution": distribution,
        "max_prop": np.asarray(maxp),
        "prediction": np.asarray(predict),
        "correct": np.asarray(ab),
        "xybit": xy_np,
    }
    return sum_correct, loss, info


# ----------------------------------------------------------------------------
if __name__ == "__main__":
    B, seqlen, xy_bits, ab_bits, num_classes = 4, 8, 3, 1, 16
    key = jax.random.PRNGKey(0)
    kp, k1, k2, k3, k4 = jax.random.split(key, 5)

    params = init_params(kp, num_classes=num_classes, xy_bits=xy_bits,
                         ab_bits=ab_bits, seqlen=seqlen)

    xy_seq = jax.random.randint(k1, (B, seqlen), 0, 2 ** xy_bits, dtype=jnp.int32)
    ab_seq = jax.random.randint(k2, (B, seqlen), 0, 2 ** ab_bits, dtype=jnp.int32)
    xy = jax.random.randint(k3, (B,), 0, 2 ** xy_bits, dtype=jnp.int32)
    ab = jax.random.randint(k4, (B,), 0, 2 ** ab_bits, dtype=jnp.int32)

    sum_correct, loss, info = bell_res_fc_forward(
        params, xy_seq, ab_seq, xy, ab,
        xy_bits=xy_bits, ab_bits=ab_bits, seqlen=seqlen)
    jax.block_until_ready((sum_correct, loss))
    print("KERNEL_OK")
</pallas_src>

<mosaic_0001>
module attributes {stable_mosaic.version = 11 : i64} {
  func.func @_linear_kernel(%arg0: i32, %arg1: memref<16x80xbf16, #tpu.memory_space<vmem>>, %arg2: memref<80x1024xbf16, #tpu.memory_space<vmem>>, %arg3: memref<1x1024xf32, #tpu.memory_space<vmem>>, %arg4: memref<16x1024xbf16, #tpu.memory_space<vmem>>) attributes {dimension_semantics = [#tpu.dimension_semantics<parallel>], iteration_bounds = array<i64: 1>, scalar_prefetch = 0 : i64, scratch_operands = 0 : i64, tpu.core_type = #tpu.core_type<tc>, window_params = [{pipeline_mode = #tpu.pipeline_mode<synchronous>, transform_indices = @transform_0, window_bounds = array<i64: 16, 80>}, {transform_indices = @transform_1, window_bounds = array<i64: 80, 1024>}, {transform_indices = @transform_2, window_bounds = array<i64: 1, 1024>}, {transform_indices = @transform_3, window_bounds = array<i64: 16, 1024>}]} {
    %c0 = arith.constant 0 : index
    %c0_0 = arith.constant 0 : index
    %0 = vector.load %arg1[%c0, %c0_0] : memref<16x80xbf16, #tpu.memory_space<vmem>>, vector<16x80xbf16>
    %c0_1 = arith.constant 0 : index
    %c0_2 = arith.constant 0 : index
    %1 = vector.load %arg2[%c0_1, %c0_2] : memref<80x1024xbf16, #tpu.memory_space<vmem>>, vector<80x1024xbf16>
    %cst = arith.constant dense<0.000000e+00> : vector<16x1024xf32>
    %2 = tpu.matmul %0, %1, %cst {dimension_numbers = #tpu.dot_dimension_numbers<[1], [0], [0], [1], [0, 0, 1, 1], [], []>} : vector<16x80xbf16>, vector<80x1024xbf16>, vector<16x1024xf32> -> vector<16x1024xf32>
    %c0_3 = arith.constant 0 : index
    %c0_4 = arith.constant 0 : index
    %3 = vector.load %arg3[%c0_3, %c0_4] : memref<1x1024xf32, #tpu.memory_space<vmem>>, vector<1x1024xf32>
    %4 = vector.broadcast %3 : vector<1x1024xf32> to vector<16x1024xf32>
    %5 = arith.addf %2, %4 : vector<16x1024xf32>
    %cst_5 = arith.constant 0.000000e+00 : f32
    %6 = vector.broadcast %cst_5 : f32 to vector<16x1024xf32>
    %7 = arith.maximumf %5, %6 : vector<16x1024xf32>
    %8 = arith.truncf %7 : vector<16x1024xf32> to vector<16x1024xbf16>
    %c0_6 = arith.constant 0 : index
    %c0_7 = arith.constant 0 : index
    %9 = vector.load %arg4[%c0_6, %c0_7] : memref<16x1024xbf16, #tpu.memory_space<vmem>>, vector<16x1024xbf16>
    tpu.vector_store %arg4[%c0_6, %c0_7], %8 {strides = array<i32>} : memref<16x1024xbf16, #tpu.memory_space<vmem>>, vector<16x1024xbf16>,
    return
  }
  func.func @transform_0(%arg0: i32) -> (i32, i32) {
    %c0_i32 = arith.constant 0 : i32
    %c0_i32_0 = arith.constant 0 : i32
    %c0_i32_1 = arith.constant 0 : i32
    return %c0_i32, %c0_i32_0 : i32, i32
  }
  func.func @transform_1(%arg0: i32) -> (i32, i32) {
    %c0_i32 = arith.constant 0 : i32
    %c0_i32_0 = arith.constant 0 : i32
    return %c0_i32, %arg0 : i32, i32
  }
  func.func @transform_2(%arg0: i32) -> (i32, i32) {
    %c0_i32 = arith.constant 0 : i32
    %c0_i32_0 = arith.constant 0 : i32
    return %c0_i32, %arg0 : i32, i32
  }
  func.func @transform_3(%arg0: i32) -> (i32, i32) {
    %c0_i32 = arith.constant 0 : i32
    %c0_i32_0 = arith.constant 0 : i32
    return %c0_i32, %arg0 : i32, i32
  }
}

</mosaic_0001>

<bundles_post_ra>
// kernel: tpu_custom_call.1
= control target key start
LH: loop header
LB: loop body
LE: loop exit
PB: predicated region body
PF: predicated region fallthrough
CT: control target
= control target key end

     0   :  { %8 = vsyncpa [#allocation3], 0  ;;  %s866_s0 = inlined_call_operand.hbm [shape: bf16[16,80], index: 0, kind: input, shape index: {}]   ;;  %s867_s1 = inlined_call_operand.hbm [shape: bf16[80,1024], index: 1, kind: input, shape index: {}]   ;;  %s868_s2 = inlined_call_operand.hbm [shape: f32[1,1024], index: 2, kind: input, shape index: {}]   ;;  %s869_s3 = inlined_call_operand.hbm [shape: bf16[16,1024], index: 3, kind: output, shape index: {}]  }
   0x1   :  { %9 = vsyncpa [#allocation6], 0 }
   0x2   :  { %10 = vsyncpa [#allocation4], 0  ;;  %s775_s12 = smov [#allocation5]   ;;  %s681_s16 = scalar_lea.hbm %s867_s1, 5120 }
   0x3   :  { %s28_s13 = sshll.u32 %s775_s12, 4  ;;  %p682_p0 = scmp.ne.s32.totalorder %s867_s1, %s681_s16  ;;  %s29_s13 = int_to_ptr.vmem [resolvable:$true] %s28_s13 }
   0x4   :  { %p685_p1 = scmp.lt.u32.totalorder %s681_s16, %s867_s1 }
   0x6   :  { %p687_p2 = pnand %p685_p1, %p682_p0 }
   0x8   :  { %690 = shalt.err (!%p687_p2)
}
   0x9   :  { %s691_s21 = scalar_lea.vmem %s29_s13, 5120  ;;  %p696_p4 = scmp.lt.s32.totalorder %s29_s13, %s29_s13 }
   0xa   :  { %p692_p3 = scmp.ne.s32.totalorder %s29_s13, %s691_s21  ;;  %p697_p5 = scmp.lt.s32.totalorder %s691_s21, %s691_s21 }
   0xc   :  { %p698_p6 = por %p697_p5, %p696_p4 }
   0xe   :  { %p699_p7 = pnand %p698_p6, %p692_p3 }
  0x10   :  { %702 = shalt.err (!%p699_p7)
}
  0x11   :  { %s776_s22 = smov 512   ;;  %s777_s23 = smov 32  }
  0x12   :  { %34 = dma.hbm_to_vmem [thread:$0]  %s867_s1, 5120, %s29_s13, [#allocation6], %s776_s22, %s776_s22, %s777_s23  }
  0x13   :  { %s778_s26 = smov [#allocation2]   ;;  %s703_s30 = scalar_lea.hbm %s866_s0, 128 }
  0x14   :  { %s16_s27 = sshll.u32 %s778_s26, 4  ;;  %p704_p8 = scmp.ne.s32.totalorder %s866_s0, %s703_s30  ;;  %s17_s27 = int_to_ptr.vmem [resolvable:$true] %s16_s27 }
  0x15   :  { %p707_p9 = scmp.lt.u32.totalorder %s703_s30, %s866_s0 }
  0x17   :  { %p709_p10 = pnand %p707_p9, %p704_p8 }
  0x19   :  { %712 = shalt.err (!%p709_p10)
}
  0x1a   :  { %s713_s8 = scalar_lea.vmem %s17_s27, 128  ;;  %p718_p12 = scmp.lt.s32.totalorder %s17_s27, %s17_s27 }
  0x1b   :  { %p714_p11 = scmp.ne.s32.totalorder %s17_s27, %s713_s8  ;;  %p719_p13 = scmp.lt.s32.totalorder %s713_s8, %s713_s8 }
  0x1d   :  { %p720_p0 = por %p719_p13, %p718_p12 }
  0x1f   :  { %p721_p1 = pnand %p720_p0, %p714_p11 }
  0x21   :  { %724 = shalt.err (!%p721_p1)
}
  0x22   :  { %s779_s1 = smov 64   ;;  %s780_s9 = smov 4  }
  0x23   :  { %22 = dma.hbm_to_vmem [thread:$0]  %s866_s0, 128, %s17_s27, [#allocation3], %s779_s1, %s779_s1, %s780_s9  }
  0x24   :  { %s781_s12 = smov [#allocation7]   ;;  %s725_s16 = scalar_lea.hbm %s868_s2, 128 }
  0x25   :  { %s41_s13 = sshll.u32 %s781_s12, 4  ;;  %p726_p2 = scmp.ne.s32.totalorder %s868_s2, %s725_s16  ;;  %s42_s13 = int_to_ptr.vmem [resolvable:$true] %s41_s13 }
  0x26   :  { %p729_p3 = scmp.lt.u32.totalorder %s725_s16, %s868_s2 }
  0x28   :  { %p731_p4 = pnand %p729_p3, %p726_p2 }
  0x2a   :  { %734 = shalt.err (!%p731_p4)
}
  0x2b   :  { %s735_s21 = scalar_lea.vmem %s42_s13, 128  ;;  %p740_p6 = scmp.lt.s32.totalorder %s42_s13, %s42_s13 }
  0x2c   :  { %p736_p5 = scmp.ne.s32.totalorder %s42_s13, %s735_s21  ;;  %p741_p7 = scmp.lt.s32.totalorder %s735_s21, %s735_s21 }
  0x2e   :  { %p742_p8 = por %p741_p7, %p740_p6 }
  0x30   :  { %p743_p9 = pnand %p742_p8, %p736_p5 }
  0x32   :  { %746 = shalt.err (!%p743_p9)
}
  0x33   :  { %44 = dma.hbm_to_vmem [thread:$0]  %s868_s2, 128, %s42_s13, [#allocation6]  }
  0x34   :  { %769 = dma.done.wait [#allocation3], 128  }
  0x35   :  { %770 = vsyncadd [#allocation3], 4294967168 }
  0x36   :  { %771 = dma.done.wait [#allocation6], 5248  }
  0x37   :  { %772 = vsyncadd [#allocation6], 4294962048  ;;  %v782_v0 = vmov 0   ;;  %v57_v1 = vld [vmem:[#allocation5] sm:$0xff]  ;;  %v58_v3 = vld [vmem:[#allocation5 + $0x8] sm:$0xff]  ;;  %vm344_vm0 = vcmask 654336  }
  0x38   :  { %380 = vmatprep.mubr.bf16.mxu0 %v782_v0  ;;  %423 = vmatprep.mubr.bf16.mxu1 %v782_v0  ;;  %v61_v2 = vld [vmem:[#allocation5 + $0x20] sm:$0xff]  ;;  %v62_v5 = vld [vmem:[#allocation5 + $0x28] sm:$0xff]  ;;  %v59_v39 = vld [vmem:[#allocation5 + $0x10] sm:$0xff]  ;;  %s783_s2 = smov [#allocation8]  }
  0x39   :  { %v612_v4 = vcombine.high %v57_v1, %v61_v2  ;;  %v611_v6 = vcombine.low %v57_v1, %v61_v2  ;;  %v65_v7 = vld [vmem:[#allocation5 + $0x40] sm:$0xff]  ;;  %v614_v9 = vcombine.high %v58_v3, %v62_v5  ;;  %v613_v10 = vcombine.low %v58_v3, %v62_v5  ;;  %v66_v12 = vld [vmem:[#allocation5 + $0x48] sm:$0xff]  ;;  %v63_v40 = vld [vmem:[#allocation5 + $0x30] sm:$0xff]  ;;  %s597_s25 = sshll.u32 %s783_s2, 4  ;;  %s598_s25 = int_to_ptr.vmem [resolvable:$true] %s597_s25 }
  0x3a   :  { %v69_v8 = vld [vmem:[#allocation5 + $0x60] sm:$0xff]  ;;  %v70_v13 = vld [vmem:[#allocation5 + $0x68] sm:$0xff]  ;;  %v60_v41 = vld [vmem:[#allocation5 + $0x18] sm:$0xff]  ;;  %v616_v45 = vcombine.high %v59_v39, %v63_v40  ;;  %v615_v52 = vcombine.low %v59_v39, %v63_v40  ;;  %s747_s26 = scalar_lea.vmem %s598_s25, 1024  ;;  %p752_p11 = scmp.lt.s32.totalorder %s598_s25, %s598_s25 }
  0x3b   :  { %v620_v11 = vcombine.high %v65_v7, %v69_v8  ;;  %v73_v14 = vld [vmem:[#allocation5 + $0x80] sm:$0xff]  ;;  %348 = vmatprep.subr.bf16.mxu0 %v612_v4  ;;  %v622_v15 = vcombine.high %v66_v12, %v70_v13  ;;  %v74_v17 = vld [vmem:[#allocation5 + $0x88] sm:$0xff]  ;;  %391 = vmatprep.subr.bf16.mxu1 %v614_v9  ;;  %v619_v19 = vcombine.low %v65_v7, %v69_v8  ;;  %v64_v42 = vld [vmem:[#allocation5 + $0x38] sm:$0xff]  ;;  %p748_p10 = scmp.ne.s32.totalorder %s598_s25, %s747_s26  ;;  %p753_p12 = scmp.lt.s32.totalorder %s747_s26, %s747_s26 }
  0x3c   :  { %v77_v16 = vld [vmem:[#allocation5 + $0xa0] sm:$0xff]  ;;  %v78_v18 = vld [vmem:[#allocation5 + $0xa8] sm:$0xff]  ;;  %349 = vmatpush1.bf16.msra.mxu0 %v611_v6  ;;  %392 = vmatpush1.bf16.msra.mxu1 %v613_v10  ;;  %v621_v20 = vcombine.low %v66_v12, %v70_v13  ;;  %v618_v46 = vcombine.high %v60_v41, %v64_v42  ;;  %v67_v47 = vld [vmem:[#allocation5 + $0x50] sm:$0xff]  ;;  %v617_v53 = vcombine.low %v60_v41, %v64_v42 }
  0x3d   :  { %350 = vmatprep.subr.bf16.mxu0 %v620_v11  ;;  %v628_v21 = vcombine.high %v73_v14, %v77_v16  ;;  %393 = vmatprep.subr.bf16.mxu1 %v622_v15  ;;  %v630_v22 = vcombine.high %v74_v17, %v78_v18  ;;  %v81_v23 = vld [vmem:[#allocation5 + $0xc0] sm:$0xff]  ;;  %v82_v25 = vld [vmem:[#allocation5 + $0xc8] sm:$0xff]  ;;  %v627_v27 = vcombine.low %v73_v14, %v77_v16  ;;  %v71_v48 = vld [vmem:[#allocation5 + $0x70] sm:$0xff]  ;;  %p754_p13 = por %p753_p12, %p752_p11 }
  0x3e   :  { %v85_v24 = vld [vmem:[#allocation5 + $0xe0] sm:$0xff]  ;;  %v86_v26 = vld [vmem:[#allocation5 + $0xe8] sm:$0xff]  ;;  %v629_v28 = vcombine.low %v74_v17, %v78_v18  ;;  %v680_v49 = vld [vmem:[#allocation2] sm:$0xff]   ;;  %v624_v54 = vcombine.high %v67_v47, %v71_v48  ;;  %v623_v60 = vcombine.low %v67_v47, %v71_v48  ;;  %v99_v18 = vlaneseq }
  0x3f   :  { %v636_v29 = vcombine.high %v81_v23, %v85_v24  ;;  %v638_v30 = vcombine.high %v82_v25, %v86_v26  ;;  %v89_v31 = vld [vmem:[#allocation5 + $0x100] sm:$0xff]  ;;  %v90_v33 = vld [vmem:[#allocation5 + $0x108] sm:$0xff]  ;;  %v635_v35 = vcombine.low %v81_v23, %v85_v24  ;;  %v637_v36 = vcombine.low %v82_v25, %v86_v26  ;;  %v68_v50 = vld [vmem:[#allocation5 + $0x58] sm:$0xff]  ;;  %p755_p0 = pnand %p754_p13, %p748_p10 }
  0x40   :  { %351 = vmatpush1.bf16.msra.mxu0 %v619_v19  ;;  %394 = vmatpush1.bf16.msra.mxu1 %v621_v20  ;;  %v93_v32 = vld [vmem:[#allocation5 + $0x120] sm:$0xff]  ;;  %v94_v34 = vld [vmem:[#allocation5 + $0x128] sm:$0xff]  ;;  %v72_v51 = vld [vmem:[#allocation5 + $0x78] sm:$0xff]  ;;  %v100_v19 = vshrl.u32 %v99_v18, 7 }
  0x41   :  { %352 = vmatprep.subr.bf16.mxu0 %v628_v21  ;;  %395 = vmatprep.subr.bf16.mxu1 %v630_v22  ;;  %v644_v37 = vcombine.high %v89_v31, %v93_v32  ;;  %v646_v38 = vcombine.high %v90_v33, %v94_v34  ;;  %v643_v43 = vcombine.low %v89_v31, %v93_v32  ;;  %v75_v56 = vld [vmem:[#allocation5 + $0x90] sm:$0xff]  ;;  %v76_v58 = vld [vmem:[#allocation5 + $0x98] sm:$0xff]  ;;  %v97_v21 = vld [vmem:[#allocation7] sm:$0xff] }
  0x42   :  { %v645_v44 = vcombine.low %v90_v33, %v94_v34  ;;  %v626_v55 = vcombine.high %v68_v50, %v72_v51  ;;  %v79_v57 = vld [vmem:[#allocation5 + $0xb0] sm:$0xff]  ;;  %v80_v59 = vld [vmem:[#allocation5 + $0xb8] sm:$0xff]  ;;  %v625_v61 = vcombine.low %v68_v50, %v72_v51  ;;  %v101_v20 = vsub.s32 0, %v100_v19 }
  0x43   :  { %v632_v62 = vcombine.high %v75_v56, %v79_v57  ;;  %v634_v63 = vcombine.high %v76_v58, %v80_v59  ;;  %v83_v1 = vld [vmem:[#allocation5 + $0xd0] sm:$0xff]  ;;  %v84_v3 = vld [vmem:[#allocation5 + $0xd8] sm:$0xff]  ;;  %v631_v5 = vcombine.low %v75_v56, %v79_v57  ;;  %v633_v6 = vcombine.low %v76_v58, %v80_v59 }
  0x44   :  { %353 = vmatpush1.bf16.msra.mxu0 %v627_v27  ;;  %396 = vmatpush1.bf16.msra.mxu1 %v629_v28  ;;  %v87_v2 = vld [vmem:[#allocation5 + $0xf0] sm:$0xff]  ;;  %v88_v4 = vld [vmem:[#allocation5 + $0xf8] sm:$0xff]  ;;  %v109_v22 = vsub.s32 2, %v100_v19  ;;  %v105_v23 = vsub.s32 1, %v100_v19  ;;  %v113_v24 = vsub.s32 3, %v100_v19  ;;  %v102_v25 = vrot.slane %v97_v21, %v101_v20 }
  0x45   :  { %354 = vmatprep.subr.bf16.mxu0 %v636_v29  ;;  %397 = vmatprep.subr.bf16.mxu1 %v638_v30  ;;  %v640_v7 = vcombine.high %v83_v1, %v87_v2  ;;  %v642_v8 = vcombine.high %v84_v3, %v88_v4  ;;  %v91_v9 = vld [vmem:[#allocation5 + $0x110] sm:$0xff]  ;;  %v92_v11 = vld [vmem:[#allocation5 + $0x118] sm:$0xff]  ;;  %v639_v13 = vcombine.low %v83_v1, %v87_v2  ;;  %v117_v57 = vsub.s32 4, %v100_v19 }
  0x46   :  { %v95_v10 = vld [vmem:[#allocation5 + $0x130] sm:$0xff]  ;;  %v96_v12 = vld [vmem:[#allocation5 + $0x138] sm:$0xff]  ;;  %v641_v14 = vcombine.low %v84_v3, %v88_v4  ;;  %v110_v26 = vrot.slane %v97_v21, %v109_v22  ;;  %v106_v27 = vrot.slane %v97_v21, %v105_v23  ;;  %v114_v28 = vrot.slane %v97_v21, %v113_v24 }
  0x47   :  { %v648_v15 = vcombine.high %v91_v9, %v95_v10  ;;  %v647_v16 = vcombine.low %v91_v9, %v95_v10  ;;  %v649_v17 = vcombine.low %v92_v11, %v96_v12  ;;  %v125_v58 = vsub.s32 6, %v100_v19 }
  0x48   :  { %355 = vmatpush1.bf16.msra.mxu0 %v635_v35  ;;  %398 = vmatpush1.bf16.msra.mxu1 %v637_v36  ;;  %v121_v59 = vsub.s32 5, %v100_v19 }
  0x49   :  { %356 = vmatprep.subr.bf16.mxu0 %v644_v37  ;;  %399 = vmatprep.subr.bf16.mxu1 %v646_v38 }
  0x4c   :  { %357 = vmatpush1.bf16.msra.mxu0 %v643_v43  ;;  %400 = vmatpush1.bf16.msra.mxu1 %v645_v44 }
  0x4d   :  { %434 = vmatprep.subr.bf16.mxu0 %v616_v45  ;;  %477 = vmatprep.subr.bf16.mxu1 %v618_v46 }
  0x4f   :  { %651 = vmatmul.mubr.msk.bf16.vlgmr.msra.gmra.mrb[0].mxu0 %vm344_vm0, %v680_v49  ;;  %652 = vmatmul.mubr.msk.bf16.vlgmr.msra.gmra.mrb[0].mxu1 %vm344_vm0, %v680_v49 }
  0x50   :  { %435 = vmatpush1.bf16.msra.mxu0 %v615_v52  ;;  %478 = vmatpush1.bf16.msra.mxu1 %v617_v53 }
  0x51   :  { %436 = vmatprep.subr.bf16.mxu0 %v624_v54  ;;  %479 = vmatprep.subr.bf16.mxu1 %v626_v55 }
  0x52   :  { %466 = vmatprep.mubr.bf16.mxu0 %v782_v0  ;;  %509 = vmatprep.mubr.bf16.mxu1 %v782_v0  ;;  %v650_v0 = vcombine.high %v92_v11, %v96_v12 }
  0x54   :  { %437 = vmatpush1.bf16.msra.mxu0 %v623_v60  ;;  %480 = vmatpush1.bf16.msra.mxu1 %v625_v61  ;;  %v129_v60 = vsub.s32 7, %v100_v19  ;;  %v118_v61 = vrot.slane %v97_v21, %v117_v57 }
  0x55   :  { %438 = vmatprep.subr.bf16.mxu0 %v632_v62  ;;  %481 = vmatprep.subr.bf16.mxu1 %v634_v63  ;;  %v126_v62 = vrot.slane %v97_v21, %v125_v58  ;;  %v122_v63 = vrot.slane %v97_v21, %v121_v59 }
  0x56   :  { %v130_v1 = vrot.slane %v97_v21, %v129_v60 }
  0x58   :  { %439 = vmatpush1.bf16.msra.mxu0 %v631_v5  ;;  %482 = vmatpush1.bf16.msra.mxu1 %v633_v6 }
  0x59   :  { %440 = vmatprep.subr.bf16.mxu0 %v640_v7  ;;  %483 = vmatprep.subr.bf16.mxu1 %v642_v8 }
  0x5c   :  { %441 = vmatpush1.bf16.msra.mxu0 %v639_v13  ;;  %484 = vmatpush1.bf16.msra.mxu1 %v641_v14 }
  0x5d   :  { %442 = vmatprep.subr.bf16.mxu0 %v648_v15  ;;  %485 = vmatprep.subr.bf16.mxu1 %v650_v0 }
  0x60   :  { %443 = vmatpush1.bf16.msra.mxu0 %v647_v16  ;;  %486 = vmatpush1.bf16.msra.mxu1 %v649_v17 }
  0x63   :  { %653 = vmatmul.mubr.msk.bf16.vlgmr.msra.gmra.mrb[4].mxu0 %vm344_vm0, %v680_v49  ;;  %654 = vmatmul.mubr.msk.bf16.vlgmr.msra.gmra.mrb[4].mxu1 %vm344_vm0, %v680_v49 }
 0x122   :  { %v382_v29 = vpop.f32.mrb[0].mxu0  ;;  %v425_v31 = vpop.f32.mrb[0].mxu1 }
 0x123   :  { %v383_v30 = vadd.f32 %v382_v29, %v102_v25  ;;  %v384_v32 = vpop.f32.mrb[1].mxu0  ;;  %v426_v33 = vadd.f32 %v425_v31, %v110_v26  ;;  %v427_v35 = vpop.f32.mrb[1].mxu1 }
 0x124   :  { %v385_v34 = vadd.f32 %v384_v32, %v106_v27  ;;  %v386_v36 = vpop.f32.mrb[2].mxu0  ;;  %v428_v38 = vadd.f32 %v427_v35, %v114_v28  ;;  %v429_v40 = vpop.f32.mrb[2].mxu1 }
 0x125   :  { %v520_v37 = vmax.f32 %v383_v30, 0.0  ;;  %v387_v39 = vadd.f32 %v386_v36, %v102_v25  ;;  %v388_v41 = vpop.f32.mrb[3].mxu0  ;;  %v522_v42 = vmax.f32 %v426_v33, 0.0  ;;  %v430_v44 = vadd.f32 %v429_v40, %v110_v26  ;;  %v431_v46 = vpop.f32.mrb[3].mxu1 }
 0x126   :  { %v521_v43 = vmax.f32 %v385_v34, 0.0  ;;  %v389_v45 = vadd.f32 %v388_v41, %v106_v27  ;;  %v523_v47 = vmax.f32 %v428_v38, 0.0  ;;  %v432_v49 = vadd.f32 %v431_v46, %v114_v28 }
 0x127   :  { %v528_v48 = vmax.f32 %v387_v39, 0.0  ;;  %v530_v51 = vmax.f32 %v430_v44, 0.0 }
 0x128   :  { %v663_v50 = vpack.c.bf16 %v521_v43, %v520_v37  ;;  %v529_v52 = vmax.f32 %v389_v45, 0.0  ;;  %v664_v53 = vpack.c.bf16 %v523_v47, %v522_v42  ;;  %v531_v54 = vmax.f32 %v432_v49, 0.0 }
 0x12a   :  { %584 = vst [vmem:[#allocation8] sm:$0xff] %v663_v50  ;;  %v667_v55 = vpack.c.bf16 %v529_v52, %v528_v48  ;;  %585 = vst [vmem:[#allocation8 + $0x8] sm:$0xff] %v664_v53  ;;  %v668_v56 = vpack.c.bf16 %v531_v54, %v530_v51 }
 0x12c   :  { %588 = vst [vmem:[#allocation8 + $0x20] sm:$0xff] %v667_v55  ;;  %589 = vst [vmem:[#allocation8 + $0x28] sm:$0xff] %v668_v56 }
 0x136   :  { %v468_v2 = vpop.f32.mrb[4].mxu0  ;;  %v511_v4 = vpop.f32.mrb[4].mxu1 }
 0x137   :  { %v469_v3 = vadd.f32 %v468_v2, %v118_v61  ;;  %v470_v5 = vpop.f32.mrb[5].mxu0  ;;  %v512_v6 = vadd.f32 %v511_v4, %v126_v62  ;;  %v513_v8 = vpop.f32.mrb[5].mxu1 }
 0x138   :  { %v471_v7 = vadd.f32 %v470_v5, %v122_v63  ;;  %v472_v9 = vpop.f32.mrb[6].mxu0  ;;  %v514_v11 = vadd.f32 %v513_v8, %v130_v1  ;;  %v515_v13 = vpop.f32.mrb[6].mxu1 }
 0x139   :  { %v524_v10 = vmax.f32 %v469_v3, 0.0  ;;  %v473_v12 = vadd.f32 %v472_v9, %v118_v61  ;;  %v474_v14 = vpop.f32.mrb[7].mxu0  ;;  %v526_v15 = vmax.f32 %v512_v6, 0.0  ;;  %v516_v16 = vadd.f32 %v515_v13, %v126_v62  ;;  %v517_v18 = vpop.f32.mrb[7].mxu1 }
 0x13a   :  { %v525_v0 = vmax.f32 %v471_v7, 0.0  ;;  %v475_v17 = vadd.f32 %v474_v14, %v122_v63  ;;  %v527_v19 = vmax.f32 %v514_v11, 0.0  ;;  %v518_v21 = vadd.f32 %v517_v18, %v130_v1 }
 0x13b   :  { %v532_v20 = vmax.f32 %v473_v12, 0.0  ;;  %v534_v23 = vmax.f32 %v516_v16, 0.0 }
 0x13c   :  { %v665_v22 = vpack.c.bf16 %v525_v0, %v524_v10  ;;  %v533_v24 = vmax.f32 %v475_v17, 0.0  ;;  %v666_v25 = vpack.c.bf16 %v527_v19, %v526_v15  ;;  %v535_v26 = vmax.f32 %v518_v21, 0.0 }
 0x13e   :  { %586 = vst [vmem:[#allocation8 + $0x10] sm:$0xff] %v665_v22  ;;  %v669_v27 = vpack.c.bf16 %v533_v24, %v532_v20  ;;  %587 = vst [vmem:[#allocation8 + $0x18] sm:$0xff] %v666_v25  ;;  %v670_v28 = vpack.c.bf16 %v535_v26, %v534_v23 }
 0x140   :  { %590 = vst [vmem:[#allocation8 + $0x30] sm:$0xff] %v669_v27  ;;  %591 = vst [vmem:[#allocation8 + $0x38] sm:$0xff] %v670_v28 }
 0x141   :  { %758 = shalt.err (!%p755_p0)
}
 0x142   :  { %s759_s29 = scalar_lea.hbm %s869_s3, 1024 }
 0x143   :  { %p760_p1 = scmp.ne.s32.totalorder %s869_s3, %s759_s29  ;;  %p763_p2 = scmp.lt.u32.totalorder %s759_s29, %s869_s3 }
 0x145   :  { %p765_p3 = pnand %p763_p2, %p760_p1 }
 0x147   :  { %768 = shalt.err (!%p765_p3)
}
 0x148   :  { %603 = dma.vmem_to_hbm [thread:$0]  %s598_s25, 1024, %s869_s3, [#allocation4], %s776_s22, %s776_s22, %s777_s23  }
 0x149   :  { %773 = dma.done.wait [#allocation4], 1024  }
 0x14a   :  { %774 = vsyncadd [#allocation4], 4294966272 }
 0x14b   :  { %607 = vsyncpa [#allocation3], 1 }
 0x14c   :  { %608 = vsyncpa [#allocation6], 1 }
 0x14d   :  { %609 = vsyncpa [#allocation4], 1 }

</bundles_post_ra>
